<compile_context>
chip_gen: v6e
topology: v6e:2x2x1
jax: 0.10.0
libtpu: 0.0.40
codegen_flags: <defaults>
</compile_context>

<pallas_src>
import jax
import jax.numpy as jnp
from jax.experimental import pallas as pl
from jax.experimental.pallas import tpu as pltpu

# Per-pass tile byte budgets for the tiled path (clamped further by VMEM).
_P1_TILE_MAX_BYTES = 16 << 20   # pass 1: only x is double-buffered
_P2_TILE_MAX_BYTES = 8 << 20    # pass 2: 2 in + 2 out buffers


def _tpu_info():
    """(vmem_capacity_bytes, tensorcores) with conservative fallbacks."""
    cap, cores = 64 << 20, 1
    try:
        info = pltpu.get_tpu_info()
        cap = int(getattr(info, "vmem_capacity_bytes", cap))
        c = getattr(info, "num_cores", None)
        if isinstance(c, int) and c > 0:
            cores = c
        else:
            # Heuristic: 64 MiB/TC parts (v7x) have 2 TensorCores per chip.
            cores = 2 if cap <= (64 << 20) else 1
    except Exception:
        pass
    return cap, cores


def _pick_hw_tile(C, HW, itemsize, max_tile_bytes):
    """Largest multiple-of-128 tile within budget (cdiv grid + masking handle
    a partial last tile).  If the budget covers all of HW, use one full-width
    tile (block dim == array dim is always a legal BlockSpec)."""
    max_t = max(128, (max_tile_bytes // max(C * itemsize, 1)) // 128 * 128)
    if max_t >= HW:
        return int(HW)
    return int(max_t)


# ---------------------------------------------------------------------------
# Fused single-pass path: one (C, HW) slab per grid step.
# ---------------------------------------------------------------------------
def _channel_attention_fused(x, w1, w2, N, C, HW, slab_bytes, w_bytes,
                             vmem_cap):
    inv_hw = 1.0 / HW

    def kernel(x_ref, w1_ref, w2_ref, o_ref):
        xb = x_ref[0].astype(jnp.float32)                        # (C, HW)
        avg = jnp.sum(xb, axis=1, keepdims=True) * inv_hw        # (C, 1)
        mxp = jnp.max(xb, axis=1, keepdims=True)                 # (C, 1)
        pooled = jnp.concatenate([avg, mxp], axis=1)             # (C, 2)
        h = jnp.maximum(
            jnp.dot(w1_ref[...], pooled,
                    preferred_element_type=jnp.float32), 0.0)    # (C//8, 2)
        o2 = jnp.dot(w2_ref[...], h,
                     preferred_element_type=jnp.float32)         # (C, 2)
        scale = jax.nn.sigmoid(o2[:, 0:1] + o2[:, 1:2])          # (C, 1)
        # Re-read the slab from VMEM so the reduction value isn't kept live
        # across the FC/sigmoid (bounds vreg pressure on large HW).
        o_ref[0] = (x_ref[0].astype(jnp.float32) * scale).astype(o_ref.dtype)

    needed = 4 * slab_bytes + 2 * w_bytes + (4 << 20)
    vmem_limit = int(min(max(needed, 32 << 20), vmem_cap))

    return pl.pallas_call(
        kernel,
        out_shape=jax.ShapeDtypeStruct((N, C, HW), x.dtype),
        grid_spec=pltpu.PrefetchScalarGridSpec(
            num_scalar_prefetch=0,
            grid=(N,),
            in_specs=[
                pl.BlockSpec((1, C, HW), lambda n: (n, 0, 0)),
                pl.BlockSpec(w1.shape, lambda n: (0, 0)),
                pl.BlockSpec(w2.shape, lambda n: (0, 0)),
            ],
            out_specs=pl.BlockSpec((1, C, HW), lambda n: (n, 0, 0)),
        ),
        compiler_params=pltpu.CompilerParams(
            dimension_semantics=("parallel",),
            vmem_limit_bytes=vmem_limit),
    )(x, w1, w2)


# ---------------------------------------------------------------------------
# Two-pass HW-tiled path for slabs that don't fit double-buffered in VMEM
# (and for keeping both TensorCores busy at tiny batch sizes).
# ---------------------------------------------------------------------------
def _channel_attention_tiled(x, w1, w2, N, C, HW, t1, t2, w_bytes, vmem_cap):
    inv_hw = 1.0 / HW
    itemsize = jnp.dtype(x.dtype).itemsize

    # ---- pass 1: streamed sum/max pooling + FC -> per-batch channel gate ----
    n1 = pl.cdiv(HW, t1)
    mask1 = (HW % t1) != 0   # static: only mask when the last tile is partial

    def pool_kernel(x_ref, w1_ref, w2_ref, scale_ref, sum_acc, max_acc):
        t = pl.program_id(1)

        @pl.when(t == 0)
        def _():
            sum_acc[...] = jnp.zeros_like(sum_acc)
            max_acc[...] = jnp.full_like(max_acc, -jnp.inf)

        xb = x_ref[0].astype(jnp.float32)                        # (C, t1)
        if mask1:
            # Padded (out-of-bounds) columns of the last tile hold garbage:
            # neutralize them (0 for sum, -inf for max).
            rem = HW - t * t1
            col = jax.lax.broadcasted_iota(jnp.int32, xb.shape, 1)
            valid = col < rem
            xs = jnp.where(valid, xb, 0.0)
            xm = jnp.where(valid, xb, -jnp.inf)
        else:
            xs = xm = xb
        sum_acc[...] += jnp.sum(xs, axis=1, keepdims=True)
        max_acc[...] = jnp.maximum(max_acc[...],
                                   jnp.max(xm, axis=1, keepdims=True))

        @pl.when(t == pl.num_programs(1) - 1)
        def _():
            pooled = jnp.concatenate(
                [sum_acc[...] * inv_hw, max_acc[...]], axis=1)   # (C, 2)
            h = jnp.maximum(
                jnp.dot(w1_ref[...], pooled,
                        preferred_element_type=jnp.float32), 0.0)
            o2 = jnp.dot(w2_ref[...], h,
                         preferred_element_type=jnp.float32)     # (C, 2)
            scale_ref[0] = jax.nn.sigmoid(o2[:, 0:1] + o2[:, 1:2])

    tile1_bytes = C * t1 * itemsize
    vmem_p1 = int(min(max(2 * tile1_bytes + 2 * w_bytes + (6 << 20), 32 << 20),
                      vmem_cap))
    scale = pl.pallas_call(
        pool_kernel,
        out_shape=jax.ShapeDtypeStruct((N, C, 1), jnp.float32),
        grid_spec=pltpu.PrefetchScalarGridSpec(
            num_scalar_prefetch=0,
            grid=(N, n1),
            in_specs=[
                pl.BlockSpec((1, C, t1), lambda n, t: (n, 0, t)),
                pl.BlockSpec(w1.shape, lambda n, t: (0, 0)),
                pl.BlockSpec(w2.shape, lambda n, t: (0, 0)),
            ],
            out_specs=pl.BlockSpec((1, C, 1), lambda n, t: (n, 0, 0)),
            scratch_shapes=[pltpu.VMEM((C, 1), jnp.float32),
                            pltpu.VMEM((C, 1), jnp.float32)],
        ),
        compiler_params=pltpu.CompilerParams(
            dimension_semantics=("parallel", "arbitrary"),
            vmem_limit_bytes=vmem_p1),
    )(x, w1, w2)

    # ---- pass 2: broadcast multiply; both grid axes independent ------------
    n2 = pl.cdiv(HW, t2)

    def scale_kernel(x_ref, s_ref, o_ref):
        # Full-width compute/store is fine on the partial last tile: the
        # out-of-bounds columns are never written back to HBM.
        o_ref[0] = (x_ref[0].astype(jnp.float32) * s_ref[0]).astype(o_ref.dtype)

    tile2_bytes = C * t2 * itemsize
    vmem_p2 = int(min(max(4 * tile2_bytes + (6 << 20), 32 << 20), vmem_cap))
    return pl.pallas_call(
        scale_kernel,
        out_shape=jax.ShapeDtypeStruct((N, C, HW), x.dtype),
        grid_spec=pltpu.PrefetchScalarGridSpec(
            num_scalar_prefetch=0,
            grid=(N, n2),
            in_specs=[
                pl.BlockSpec((1, C, t2), lambda n, t: (n, 0, t)),
                pl.BlockSpec((1, C, 1), lambda n, t: (n, 0, 0)),
            ],
            out_specs=pl.BlockSpec((1, C, t2), lambda n, t: (n, 0, t)),
        ),
        compiler_params=pltpu.CompilerParams(
            dimension_semantics=("parallel", "parallel"),
            vmem_limit_bytes=vmem_p2),
    )(x, scale)


def channel_attention(x_nchw, w1, w2, *, force_tiled=False, io_dtype=None,
                      _tile_override=None):
    """x_nchw: (N, C, H, W); w1: (C//8, C); w2: (C, C//8).

    io_dtype: optional streaming dtype for x / output (e.g. jnp.bfloat16) to
    halve HBM traffic; pooling, FC and gate math stay in f32.
    """
    N, C, H, W = x_nchw.shape
    HW = H * W
    io_dt = jnp.dtype(io_dtype) if io_dtype is not None else jnp.dtype(
        x_nchw.dtype)
    x = x_nchw.astype(io_dt).reshape(N, C, HW)
    itemsize = io_dt.itemsize
    slab_bytes = C * HW * itemsize
    w_bytes = (w1.size + w2.size) * jnp.dtype(w1.dtype).itemsize

    # Generation-aware VMEM budget: capacity minus compiler/pipeline headroom.
    vmem_capacity, cores = _tpu_info()
    vmem_cap = vmem_capacity - max(vmem_capacity // 8, 12 << 20)
    # Fused path keeps 2 in + 2 out slab buffers + weights + margin in VMEM.
    fused_max_slab = max((vmem_cap - w_bytes - (8 << 20)) // 4, 0)

    # Per-pass tile sizes for the tiled path.
    if _tile_override is not None:
        t1 = t2 = int(HW if _tile_override >= HW else _tile_override)
    else:
        p1_budget = min(max((vmem_cap - w_bytes - (8 << 20)) // 2, 1 << 20),
                        _P1_TILE_MAX_BYTES)
        p2_budget = min(max((vmem_cap - (8 << 20)) // 4, 1 << 20),
                        _P2_TILE_MAX_BYTES)
        t1 = _pick_hw_tile(C, HW, itemsize, p1_budget)
        t2 = _pick_hw_tile(C, HW, itemsize, p2_budget)

    use_tiled = force_tiled or slab_bytes > fused_max_slab
    if not use_tiled and cores > 1 and N < cores:
        # Small-batch megacore: pass 2 of the tiled path parallelizes over the
        # tile axis too, keeping every TensorCore busy on the dominant traffic.
        if N * pl.cdiv(HW, t2) >= cores:
            use_tiled = True

    if use_tiled:
        out = _channel_attention_tiled(x, w1, w2, N, C, HW, t1, t2, w_bytes,
                                       vmem_cap)
    else:
        out = _channel_attention_fused(x, w1, w2, N, C, HW, slab_bytes,
                                       w_bytes, vmem_cap)
    return out.reshape(N, C, H, W)


def channel_attention_ref(x, w1, w2):
    """Pure-JAX reference matching the PyTorch forward."""
    avg = jnp.mean(x, axis=(2, 3), keepdims=True)
    mxp = jnp.max(x, axis=(2, 3), keepdims=True)

    def fc_path(p):
        h = jnp.einsum("oc,nchw->nohw", w1, p)
        h = jnp.maximum(h, 0.0)
        return jnp.einsum("co,nohw->nchw", w2, h)

    out = fc_path(avg) + fc_path(mxp)
    return jax.nn.sigmoid(out) * x


if __name__ == "__main__":
    # Small shapes consistent with the module (in_planes must be >= 8).
    N, C, H, W = 2, 16, 16, 16
    Ch = C // 8  # hidden channels of the squeeze (PyTorch hardcodes //8)

    key = jax.random.PRNGKey(0)
    kx, k1, k2, kx2 = jax.random.split(key, 4)

    x = jax.random.normal(kx, (N, C, H, W), dtype=jnp.float32)
    # Deterministic, kaiming-ish scaled weights for the 1x1 convs (no bias).
    w1 = jax.random.normal(k1, (Ch, C), dtype=jnp.float32) * (2.0 / C) ** 0.5
    w2 = jax.random.normal(k2, (C, Ch), dtype=jnp.float32) * (2.0 / Ch) ** 0.5

    y_ref = channel_attention_ref(x, w1, w2)

    # 1) Fused single-pass path (slab fits VMEM at these shapes).
    y = jax.block_until_ready(channel_attention(x, w1, w2))
    assert y.shape == (N, C, H, W)
    assert jnp.allclose(y, y_ref, atol=1e-5, rtol=1e-5), "fused mismatch"

    # 2) Two-pass HW-tiled path (used for large feature maps / tiny batches).
    y_t = jax.block_until_ready(channel_attention(x, w1, w2, force_tiled=True))
    assert jnp.allclose(y_t, y_ref, atol=1e-5, rtol=1e-5), "tiled mismatch"

    # 3) Tiled path with a non-divisible HW and a partial (masked) last tile.
    x_odd = jax.random.normal(kx2, (1, C, 15, 9), dtype=jnp.float32)
    y_odd_ref = channel_attention_ref(x_odd, w1, w2)
    y_odd = jax.block_until_ready(
        channel_attention(x_odd, w1, w2, force_tiled=True, _tile_override=128))
    assert jnp.allclose(y_odd, y_odd_ref, atol=1e-5, rtol=1e-5), \
        "masked-tile mismatch"

    # 4) bf16 I/O variant (pooling/FC/gate stay f32); loose tolerance vs the
    #    reference evaluated on the bf16-rounded input.
    y_bf = jax.block_until_ready(
        channel_attention(x, w1, w2, io_dtype=jnp.bfloat16))
    x_bf = x.astype(jnp.bfloat16).astype(jnp.float32)
    y_bf_ref = channel_attention_ref(x_bf, w1, w2)
    assert jnp.allclose(y_bf.astype(jnp.float32), y_bf_ref,
                        atol=2e-2, rtol=2e-2), "bf16 mismatch"

    print("KERNEL_OK")
</pallas_src>

<mosaic_0001>
module attributes {stable_mosaic.version = 11 : i64} {
  func.func @kernel(%arg0: i32, %arg1: memref<1x16x256xf32, #tpu.memory_space<vmem>>, %arg2: memref<2x16xf32, #tpu.memory_space<vmem>>, %arg3: memref<16x2xf32, #tpu.memory_space<vmem>>, %arg4: memref<1x16x256xf32, #tpu.memory_space<vmem>>) attributes {dimension_semantics = [#tpu.dimension_semantics<parallel>], iteration_bounds = array<i64: 2>, scalar_prefetch = 0 : i64, scratch_operands = 0 : i64, tpu.core_type = #tpu.core_type<tc>, window_params = [{transform_indices = @transform_0, window_bounds = array<i64: 1, 16, 256>}, {pipeline_mode = #tpu.pipeline_mode<synchronous>, transform_indices = @transform_1, window_bounds = array<i64: 2, 16>}, {pipeline_mode = #tpu.pipeline_mode<synchronous>, transform_indices = @transform_2, window_bounds = array<i64: 16, 2>}, {transform_indices = @transform_3, window_bounds = array<i64: 1, 16, 256>}]} {
    %c0 = arith.constant 0 : index
    %c0_0 = arith.constant 0 : index
    %c0_1 = arith.constant 0 : index
    %0 = vector.load %arg1[%c0, %c0_0, %c0_1] : memref<1x16x256xf32, #tpu.memory_space<vmem>>, vector<1x16x256xf32>
    %1 = vector.shape_cast %0 : vector<1x16x256xf32> to vector<16x256xf32>
    %cst = arith.constant dense<0.000000e+00> : vector<16xf32>
    %2 = vector.multi_reduction <add>, %1, %cst [1] : vector<16x256xf32> to vector<16xf32>
    %3 = vector.shape_cast %2 : vector<16xf32> to vector<16x1xf32>
    %cst_2 = arith.constant 3.906250e-03 : f32
    %4 = vector.broadcast %cst_2 : f32 to vector<16x1xf32>
    %5 = arith.mulf %3, %4 : vector<16x1xf32>
    %cst_3 = arith.constant dense<0xFF800000> : vector<16xf32>
    %6 = vector.multi_reduction <maximumf>, %1, %cst_3 [1] : vector<16x256xf32> to vector<16xf32>
    %7 = vector.shape_cast %6 : vector<16xf32> to vector<16x1xf32>
    %8 = tpu.concatenate %5, %7 in 1 : vector<16x1xf32>, vector<16x1xf32> -> vector<16x2xf32>
    %c0_4 = arith.constant 0 : index
    %c0_5 = arith.constant 0 : index
    %9 = vector.load %arg2[%c0_4, %c0_5] : memref<2x16xf32, #tpu.memory_space<vmem>>, vector<2x16xf32>
    %cst_6 = arith.constant dense<0.000000e+00> : vector<2x2xf32>
    %10 = tpu.matmul %9, %8, %cst_6 {dimension_numbers = #tpu.dot_dimension_numbers<[1], [0], [0], [1], [0, 0, 1, 1], [], []>} : vector<2x16xf32>, vector<16x2xf32>, vector<2x2xf32> -> vector<2x2xf32>
    %cst_7 = arith.constant 0.000000e+00 : f32
    %11 = vector.broadcast %cst_7 : f32 to vector<2x2xf32>
    %12 = arith.maximumf %10, %11 : vector<2x2xf32>
    %c0_8 = arith.constant 0 : index
    %c0_9 = arith.constant 0 : index
    %13 = vector.load %arg3[%c0_8, %c0_9] : memref<16x2xf32, #tpu.memory_space<vmem>>, vector<16x2xf32>
    %cst_10 = arith.constant dense<0.000000e+00> : vector<16x2xf32>
    %14 = tpu.matmul %13, %12, %cst_10 {dimension_numbers = #tpu.dot_dimension_numbers<[1], [0], [0], [1], [0, 0, 1, 1], [], []>} : vector<16x2xf32>, vector<2x2xf32>, vector<16x2xf32> -> vector<16x2xf32>
    %15 = vector.extract_strided_slice %14 {offsets = [0, 0], sizes = [16, 1], strides = [1, 1]} : vector<16x2xf32> to vector<16x1xf32>
    %16 = vector.extract_strided_slice %14 {offsets = [0, 1], sizes = [16, 1], strides = [1, 1]} : vector<16x2xf32> to vector<16x1xf32>
    %17 = arith.addf %15, %16 : vector<16x1xf32>
    %18 = arith.negf %17 : vector<16x1xf32>
    %19 = math.exp %18 : vector<16x1xf32>
    %cst_11 = arith.constant 1.000000e+00 : f32
    %20 = vector.broadcast %cst_11 : f32 to vector<16x1xf32>
    %21 = arith.addf %20, %19 : vector<16x1xf32>
    %22 = arith.divf %20, %21 : vector<16x1xf32>
    %c0_12 = arith.constant 0 : index
    %c0_13 = arith.constant 0 : index
    %c0_14 = arith.constant 0 : index
    %23 = vector.load %arg1[%c0_12, %c0_13, %c0_14] : memref<1x16x256xf32, #tpu.memory_space<vmem>>, vector<1x16x256xf32>
    %24 = vector.shape_cast %23 : vector<1x16x256xf32> to vector<16x256xf32>
    %25 = vector.broadcast %22 : vector<16x1xf32> to vector<16x256xf32>
    %26 = arith.mulf %24, %25 : vector<16x256xf32>
    %c0_15 = arith.constant 0 : index
    %c0_16 = arith.constant 0 : index
    %c0_17 = arith.constant 0 : index
    %27 = vector.load %arg4[%c0_15, %c0_16, %c0_17] : memref<1x16x256xf32, #tpu.memory_space<vmem>>, vector<1x16x256xf32>
    %28 = vector.shape_cast %27 : vector<1x16x256xf32> to vector<16x256xf32>
    %29 = vector.shape_cast %26 : vector<16x256xf32> to vector<1x16x256xf32>
    tpu.vector_store %arg4[%c0_15, %c0_16, %c0_17], %29 {strides = array<i32>} : memref<1x16x256xf32, #tpu.memory_space<vmem>>, vector<1x16x256xf32>,
    return
  }
  func.func @transform_0(%arg0: i32) -> (i32, i32, i32) {
    %c0_i32 = arith.constant 0 : i32
    %c0_i32_0 = arith.constant 0 : i32
    %c0_i32_1 = arith.constant 0 : i32
    return %arg0, %c0_i32, %c0_i32_0 : i32, i32, i32
  }
  func.func @transform_1(%arg0: i32) -> (i32, i32) {
    %c0_i32 = arith.constant 0 : i32
    %c0_i32_0 = arith.constant 0 : i32
    %c0_i32_1 = arith.constant 0 : i32
    return %c0_i32, %c0_i32_0 : i32, i32
  }
  func.func @transform_2(%arg0: i32) -> (i32, i32) {
    %c0_i32 = arith.constant 0 : i32
    %c0_i32_0 = arith.constant 0 : i32
    %c0_i32_1 = arith.constant 0 : i32
    return %c0_i32, %c0_i32_0 : i32, i32
  }
  func.func @transform_3(%arg0: i32) -> (i32, i32, i32) {
    %c0_i32 = arith.constant 0 : i32
    %c0_i32_0 = arith.constant 0 : i32
    %c0_i32_1 = arith.constant 0 : i32
    return %arg0, %c0_i32, %c0_i32_0 : i32, i32, i32
  }
}

</mosaic_0001>

<bundles_post_ra>
// kernel: tpu_custom_call.1
= control target key start
LH: loop header
LB: loop body
LE: loop exit
PB: predicated region body
PF: predicated region fallthrough
CT: control target
= control target key end

     0   :  { %8 = vsyncpa [#allocation3], 0  ;;  %s916_s0 = inlined_call_operand.hbm [shape: f32[2,16,256], index: 0, kind: input, shape index: {}]   ;;  %s917_s1 = inlined_call_operand.vmem [shape: f32[2,16], index: 1, kind: input, shape index: {}]   ;;  %s918_s2 = inlined_call_operand.vmem [shape: f32[16,2], index: 2, kind: input, shape index: {}]   ;;  %s919_s3 = inlined_call_operand.hbm [shape: f32[2,16,256], index: 3, kind: output, shape index: {}]  }
   0x1   :  { %10 = vsyncpa [#allocation3 + $0x1], 0 }
   0x2   :  { %11 = vsyncpa [#allocation4], 0 }
   0x3   :  { %13 = vsyncpa [#allocation4 + $0x1], 0  ;;  %s729_s12 = smov 0   ;;  %s731_s13 = smov 0  }
   0x4   :  { %s733_s14 = smov 0   ;;  %s735_s15 = smov 0  }
   0x5 LB: > { %s750_s16 = sadd.s32 4294967295, %s697_s15   ;;  %s501_s17 = sadd.s32 4294967294, %s697_s15   ;;  %s697_s15 = sphi %s735_s15, %s934_s15   ;;  %s693_s14 = sphi %s733_s14, %s933_s14   ;;  %s689_s13 = sphi %s731_s13, %s932_s13   ;;  %s685_s12 = sphi %s729_s12, %s931_s12  }
   0x6   : > { %s754_s18 = sadd.s32 1, %s697_s15   ;;  %s26_s19 = sadd.s32 1, %s693_s14 }
   0x7   : > { %s23_s20 = ssub.s32 %s697_s15, %s754_s18  ;;  %p33_p0 = scmp.ne.s32.totalorder %s693_s14, %s689_s13 }
   0x8   : > { %p24_p1 = scmp.eq.s32.totalorder %s23_s20, 0  ;;  %p34_p2 = scmp.eq.s32.totalorder %s697_s15, 0 }
   0x9   : > { %p39_p3 = scmp.ne.s32.totalorder %s689_s13, %s685_s12  ;;  %p40_p4 = scmp.eq.s32.totalorder %s750_s16, 0 }
   0xa   : > { %s766_s21 = scalar_select %p24_p1, %s693_s14, %s26_s19  }
   0xb   : > { %p768_p5 = por %p34_p2, %p33_p0  ;;  %p772_p6 = por %p40_p4, %p39_p3 }
   0xc   : > { %p105_p7 = scmp.eq.s32.totalorder %s750_s16, 1  ;;  %p111_p8 = scmp.eq.s32.totalorder %s501_s17, 1 }
   0xd   : > { %s923_s23 = scalar_select %p772_p6, 1, 0 }
   0xe   : > { %p553_p10 = scmp.lt.s32.totalorder %s697_s15, 2  ;;  %p779_p11 = por %p105_p7, %p33_p0 }
   0xf   : > { %p783_p12 = por %p111_p8, %p39_p3  ;;  %s137_s26 = sand.u32 1, %s693_s14  }
  0x10   : > { %s924_s24 = scalar_select %p779_p11, 1, 0 }
  0x11   : > { %s925_s25 = scalar_select %p783_p12, 1, 0 }
  0x12   : > { %s521_s27 = sshll.u32 %s697_s15, 9  ;;  %s504_s28 = sshll.u32 %s137_s26, 5 }
  0x13   : > { %s792_s4 = scalar_lea.hbm %s916_s0, %s521_s27  ;;  %s141_s5 = scalar_lea.vmem [#allocation2], %s504_s28 }
  0x14   : > { %s148_s6 = sshll.u32 %s141_s5, 4  ;;  %p796_p13 = pnand %p553_p10, %p768_p5  ;;  %s800_s6 = int_to_ptr.vmem [resolvable:$true] %s148_s6 }
  0x15   : > { %s802_s8 = scalar_lea.sflag [#allocation3], %s137_s26  ;;  %s605_s9 = scalar_lea.hbm %s792_s4, 512 }
  0x16   : > { %p606_p0 = scmp.ne.s32.totalorder %s792_s4, %s605_s9  ;;  %p607_p1 = pneg %p796_p13 }
  0x17   : > { %s610_s17 = scalar_lea.hbm %s916_s0, 1024  ;;  %p611_p4 = scmp.lt.s32.totalorder %s792_s4, %s916_s0 }
  0x18   : > { %p608_p2 = pnand %p607_p1, %p606_p0  ;;  %p612_p5 = scmp.lt.s32.totalorder %s610_s17, %s605_s9 }
  0x1a   : > { %p609_p3 = pneg %p608_p2  ;;  %p613_p7 = por %p612_p5, %p611_p4 }
  0x1c   : > { %p614_p8 = pnand %p613_p7, %p609_p3 }
  0x1e   : > { %617 = shalt.err (!%p614_p8)
}
  0x1f   : > { %s618_s22 = scalar_lea.vmem %s800_s6, 512  ;;  %s699_s26 = smov [#allocation2]  }
  0x20   : > { %p619_p10 = scmp.ne.s32.totalorder %s800_s6, %s618_s22  ;;  %s623_s27 = sshll.u32 %s699_s26, 4  ;;  %s624_s27 = int_to_ptr.vmem [resolvable:$false] %s623_s27 }
  0x21   : > { %s625_s28 = scalar_lea.vmem %s624_s27, 1024  ;;  %p626_p2 = scmp.lt.s32.totalorder %s800_s6, %s624_s27 }
  0x22   : > { %p621_p9 = pnand %p619_p10, %p607_p1  ;;  %p627_p12 = scmp.lt.s32.totalorder %s625_s28, %s618_s22 }
  0x24   : > { %p622_p0 = pneg %p621_p9  ;;  %p628_p11 = por %p627_p12, %p626_p2 }
  0x26   : > { %p629_p6 = pnand %p628_p11, %p622_p0 }
  0x28   : > { %632 = shalt.err (!%p629_p6)
}
  0x29   : > { %s700_s29 = smov 256   ;;  %s701_s30 = smov 16  }
  0x2a   : > { %548 = dma.hbm_to_vmem [thread:$0]  (!%p796_p13), %s792_s4, 512, %s800_s6, %s802_s8, %s700_s29, %s700_s29, %s701_s30  }
  0x2b   : > { %p507_p9 = scmp.ge.s32.totalorder %s697_s15, 1  ;;  %p156_p1 = scmp.lt.s32.totalorder %s697_s15, 3 }
  0x2d   : > { %p157_p3 = pnand %p507_p9, %p156_p1 }
  0x2e   : > { %s826_s5 = sand.u32 (!%p157_p3), 1, %s689_s13   ;;  %p927_p6 = scmp.ne.s32.totalorder (!%p157_p3), %s923_s23, 0 }
  0x2f   : > { %160 = sbr.rel (%p157_p3) target bundleno = 887 (0x377), region = 32  ;;  %s508_s9 = sshll.u32 (!%p157_p3), %s826_s5, 5 }
  0x30   : > { %s163_s10 = scalar_lea.sflag (!%p157_p3), [#allocation3], %s826_s5  ;;  %s166_s11 = scalar_lea.vmem (!%p157_p3), [#allocation2], %s508_s9 }
  0x34   : > { %676 = dma.done.wait (%p927_p6), %s163_s10, 512  }
  0x35   : > { %678 = vsyncadd (%p927_p6), %s163_s10, 4294966784  ;;  %v836_v0 = vld [vmem:[%s166_s11 + $0x10] sm:$0xff]  ;;  %v838_v1 = vld [vmem:[%s166_s11 + $0x18] sm:$0xff]  ;;  %v702_v8 = vmov 0.0   ;;  %vm703_vm0 = vmmov 0   ;;  %vm207_vm1 = vcmask 7168  }
  0x36   : > { %v840_v2 = vld [vmem:[%s166_s11] sm:$0xff]  ;;  %v196_v3 = vadd.f32 %v838_v1, %v836_v0  ;;  %v204_v4 = vmax.f32 %v836_v0, %v838_v1  ;;  %v846_v5 = vld [vmem:[%s166_s11 + $0x8] sm:$0xff]  ;;  %529 = vmatprep.subr.mxu0 %v702_v8  ;;  %533 = vmatprep.mubr.msk.f32.mxu0 %vm703_vm0, %v702_v8  ;;  %vm211_vm2 = vcmask 130048   ;;  %vm288_vm3 = vcmask 15360   ;;  %s704_s19 = smov 127   ;;  %s188_s20 = scalar_lea.vmem [#allocation5], %s508_s9 }
  0x37   : > { %v193_v6 = vadd.f32 %v846_v5, %v840_v2  ;;  %v201_v7 = vmax.f32 %v840_v2, %v846_v5  ;;  %v210_v16 = vld [vmem:[%s917_s1] sm:$0x3]  ;;  %vm295_vm4 = vcmask 1041408   ;;  %v287_v22 = vld [vmem:[%s918_s2 + $0x8] sm:$0xff]  ;;  %v705_v25 = vmov 0   ;;  %s428_s22 = sshll.u32 %s188_s20, 4  ;;  %s866_s22 = int_to_ptr.vmem [resolvable:$true] %s428_s22 }
  0x38   : > { %197 = vadd.xlane.f32.xlu0 %v196_v3  ;;  %205 = vmax.xlane.f32.xlu1 %v204_v4  ;;  %v286_v18 = vld [vmem:[%s918_s2] sm:$0xff]  ;;  %s522_s26 = sshll.u32 %s750_s16, 9  ;;  %s415_s16 = scalar_lea.sflag [#allocation4], %s826_s5 }
  0x39   : > { %538 = vmatprep.mubr.msk.f32.mxu1 %vm288_vm3, %v286_v18  ;;  %595 = vset.pattern.permute.xlu1 %v705_v25  ;;  %s871_s29 = scalar_lea.hbm %s919_s3, %s522_s26  ;;  %s633_s30 = scalar_lea.vmem %s866_s22, 512 }
  0x3a   : > { %596 = vset.pattern.permute.xlu0 %v705_v25  ;;  %p634_p11 = scmp.ne.s32.totalorder %s866_s22, %s633_s30  ;;  %p928_p12 = scmp.ne.s32.totalorder %s924_s24, 0 }
  0x3b   : > { %s706_s9 = smov [#allocation5]  }
  0x3c   : > { %194 = vadd.xlane.f32.xlu0 %v193_v6  ;;  %202 = vmax.xlane.f32.xlu1 %v201_v7  ;;  %p635_p13 = pnand %p634_p11, %p928_p12  ;;  %s637_s10 = sshll.u32 %s706_s9, 4  ;;  %s638_s10 = int_to_ptr.vmem [resolvable:$false] %s637_s10 }
  0x3d   : > { %s639_s11 = scalar_lea.vmem %s638_s10, 1024  ;;  %p640_p5 = scmp.lt.s32.totalorder %s866_s22, %s638_s10 }
  0x3e   : > { %p636_p4 = pneg %p635_p13  ;;  %p641_p7 = scmp.lt.s32.totalorder %s639_s11, %s633_s30 }
  0x40   : > { %p642_p8 = por %p641_p7, %p640_p5 }
  0x42   : > { %p643_p10 = pnand %p642_p8, %p636_p4 }
  0xc1   : > { %v198_v9 = vpop.xlane.xlu0 %197  ;;  %v206_v10 = vpop.xlane.xlu1 %205 }
  0xc2   : > { %v200_v11 = vmul.f32 0.00390625, %v198_v9 }
  0xc4   : > { %v209_v12 = vsel %vm207_vm1, %v200_v11, %v206_v10 }
  0xc5   : > { %530 = vmatpush3.msra.mxu0 %v209_v12  ;;  %v195_v13 = vpop.xlane.xlu0 %194  ;;  %v203_v14 = vpop.xlane.xlu1 %202 }
  0xc6   : > { %v199_v15 = vmul.f32 0.00390625, %v195_v13  ;;  %531 = vmatprep.subr.mxu0 %v702_v8 }
  0xc8   : > { %v208_v17 = vsel %vm207_vm1, %v199_v15, %v203_v14 }
  0xc9   : > { %532 = vmatpush3.msra.mxu0 %v208_v17 }
  0xca   : > { %534 = vmatmul.mubr.msk.f32.vlgmr.msra.gmra.mxu0 %vm211_vm2, %v210_v16 }
 0x18a   : > { %v281_v19 = vpop.f32.mrf.mxu0 }
 0x18b   : > { %v285_v20 = vmax.f32 %v281_v19, 0.0 }
 0x18c   : > { %v535_v21 = vpop.f32.mrf.mxu0 }
 0x18d   : > { %536 = vmatprep.subr.msk.mxu1 %vm295_vm4, %v285_v20 }
 0x18e   : > { %537 = vmatpush3.msk.msra.mxu1 %vm295_vm4, %v285_v20 }
 0x18f   : > { %539 = vmatmul.mubr.msk.f32.vlgmr.msra.gmra.mxu1 %vm288_vm3, %v287_v22 }
 0x24f   : > { %v540_v23 = vpop.f32.mrf.mxu1 }
 0x250   : > { %378 = vrot.lane.b32.xlu1 %v540_v23, %s704_s19 }
 0x251   : > { %v365_v24 = vpop.f32.mrf.mxu1 }
 0x252   : > { %376 = vrot.lane.b32.xlu0 %v365_v24, %s704_s19 }
 0x2c2   : > { %v379_v26 = vpop.permute.xlu1 %378 }
 0x2c3   : > { %v383_v27 = vadd.f32 %v540_v23, %v379_v26 }
 0x2c4   : > { %v377_v28 = vpop.permute.xlu0 %376 }
 0x2c5   : > { %v515_v29 = vmul.f32 -1.442695, %v383_v27  ;;  %v382_v30 = vadd.f32 %v377_v28, %v365_v24 }
 0x2c7   : > { %v514_v31 = vmul.f32 -1.442695, %v382_v30  ;;  %597 = vpow2.f32 %v515_v29 }
 0x2c9   : > { %599 = vpow2.f32 %v514_v31 }
 0x2d4   : > { %v598_v32 = vpop.eup %597 }
 0x2d5   : > { %v391_v35 = vadd.f32 1.0, %v598_v32 }
 0x2d6   : > { %v600_v33 = vpop.eup %599 }
 0x2d7   : > { %v390_v34 = vadd.f32 1.0, %v600_v33 }
 0x2d9   : > { %601 = vrcp.f32 %v390_v34 }
 0x2da   : > { %603 = vrcp.f32 %v391_v35 }
 0x2e6   : > { %v602_v36 = vpop.eup %601 }
 0x2e7   : > { %398 = vperm.xlu1 %595, %v602_v36   ;;  %v604_v37 = vpop.eup %603 }
 0x2eb   : > { %403 = vperm.xlu1 %595, %v604_v37  }
 0x362   : > { %v399_v38 = vpop.permute.xlu1 %398 }
 0x363   : > { %v406_v39 = vmul.f32 %v399_v38, %v840_v2  ;;  %v407_v40 = vmul.f32 %v399_v38, %v846_v5 }
 0x365   : > { %410 = vst [vmem:[%s188_s20] sm:$0xff] %v406_v39  ;;  %411 = vst [vmem:[%s188_s20 + $0x8] sm:$0xff] %v407_v40 }
 0x366   : > { %v404_v41 = vpop.permute.xlu1 %403 }
 0x367   : > { %v408_v42 = vmul.f32 %v404_v41, %v836_v0  ;;  %v409_v43 = vmul.f32 %v404_v41, %v838_v1 }
 0x369   : > { %412 = vst [vmem:[%s188_s20 + $0x10] sm:$0xff] %v408_v42  ;;  %413 = vst [vmem:[%s188_s20 + $0x18] sm:$0xff] %v409_v43 }
 0x36a   : > { %646 = shalt.err (!%p643_p10)
}
 0x36b   : > { %s647_s23 = scalar_lea.hbm %s871_s29, 512  ;;  %s651_s7 = scalar_lea.hbm %s919_s3, 1024 }
 0x36c   : > { %p648_p0 = scmp.ne.s32.totalorder %s871_s29, %s647_s23  ;;  %p652_p1 = scmp.lt.s32.totalorder %s871_s29, %s919_s3 }
 0x36d   : > { %p653_p3 = scmp.lt.s32.totalorder %s651_s7, %s647_s23 }
 0x36e   : > { %p649_p2 = pnand %p648_p0, %p928_p12 }
 0x36f   : > { %p654_p6 = por %p653_p3, %p652_p1 }
 0x370   : > { %p650_p9 = pneg %p649_p2 }
 0x372   : > { %p655_p11 = pnand %p654_p6, %p650_p9 }
 0x374   : > { %658 = shalt.err (!%p655_p11)
}
 0x375   : > { %s707_s19 = smov 256   ;;  %s708_s20 = smov 16  }
 0x376   : > { %543 = dma.vmem_to_hbm [thread:$0]  (%p928_p12), %s866_s22, 512, %s871_s29, %s415_s16, %s707_s19, %s707_s19, %s708_s20  }
 0x377 PF: > { %s443_s26 = sand.u32 1, %s685_s12   ;;  %p929_p13 = scmp.ne.s32.totalorder %s925_s25, 0 }
 0x378   : > { %p930_p4 = scmp.ge.s32.totalorder %s697_s15, 2  ;;  %s444_s27 = scalar_lea.sflag [#allocation4], %s443_s26 }
 0x37a   : > { %p550_p5 = pnand %p930_p4, %p929_p13 }
 0x37c   : > { %p551_p7 = pneg %p550_p5 }
 0x37e   : > { %680 = dma.done.wait (%p551_p7), %s444_s27, 512  }
 0x37f   : > { %682 = vsyncadd (%p551_p7), %s444_s27, 4294966784  ;;  %p16_p8 = scmp.ge.s32.totalorder %s754_s18, 4   ;;  %s931_s12 = smov %s689_s13 }
 0x380   : > { %s932_s13 = smov %s693_s14  ;;  %s933_s14 = smov %s766_s21 }
 0x381   : > { %s934_s15 = smov %s754_s18  ;;  %18 = sbr.rel (!%p16_p8) target bundleno = 5 (0x5), region = 77 }
 0x386   :  { %449 = vsyncpa [#allocation3], 1 }
 0x387   :  { %451 = vsyncpa [#allocation3 + $0x1], 1 }
 0x388   :  { %452 = vsyncpa [#allocation4], 1 }
 0x389   :  { %454 = vsyncpa [#allocation4 + $0x1], 1 }

</bundles_post_ra>
